<compile_context>
chip_gen: v7x
topology: tpu7x:2x2x1
jax: 0.10.0
libtpu: 0.0.40
codegen_flags: <defaults>
</compile_context>

<pallas_src>
import functools

import jax
import jax.numpy as jnp
import numpy as np
from jax.experimental import pallas as pl
from jax.experimental.pallas import tpu as pltpu

BN_EPS = 1e-5
LANE = 128          # channel dims are zero-padded to a full lane width
SUBLANE = 8
MAX_TN = 256        # node-row tile (multiple of 8)
HI = jax.lax.Precision.HIGHEST


def _round_up(v, m):
    return (v + m - 1) // m * m


def _choose_tn(n):
    return min(MAX_TN, _round_up(n, SUBLANE))


# ----------------------------------------------------------------------------
# Pallas kernels (all tiled over node rows; grid axis marked "parallel")
# ----------------------------------------------------------------------------
def _agg_kernel(a_ref, xb_ref, x_ref, wg_t_ref, bg_ref, wc1_t_ref, bc1_ref,
                wr_t_ref, br_ref, h_ref, r_ref):
    """GCNConv + ReLU + grouped 1x1 conv, plus the fc_res residual branch."""
    # bf16 x bf16 -> f32 accumulate on the MXU;  A @ (X Wg^T) == (A @ X) @ Wg^T.
    ax = jnp.dot(a_ref[...], xb_ref[...], preferred_element_type=jnp.float32)
    g = jnp.dot(ax, wg_t_ref[...], preferred_element_type=jnp.float32) + bg_ref[...]
    g = jnp.maximum(g, 0.0)                                        # F.relu
    # grouped 1x1 Conv1d == block-diagonal channel matmul (pre-transposed).
    h_ref[...] = (jnp.dot(g, wc1_t_ref[...], preferred_element_type=jnp.float32)
                  + bc1_ref[...])
    # fc_res Linear on the (f32) layer input.
    r_ref[...] = (jnp.dot(x_ref[...], wr_t_ref[...], preferred_element_type=jnp.float32)
                  + br_ref[...])


def _mid_kernel(h_ref, r_ref, s1_ref, t1_ref, wf1_t_ref, bf1_ref, y_ref, f1_ref):
    """batch_norms_conv1d (folded scale/shift) + residual add, then fcn conv1."""
    y = h_ref[...] * s1_ref[...] + t1_ref[...] + r_ref[...]
    y_ref[...] = y
    f1_ref[...] = (jnp.dot(y, wf1_t_ref[...], preferred_element_type=jnp.float32)
                   + bf1_ref[...])


def _fcn2_kernel(f1_ref, s2_ref, t2_ref, wf2_t_ref, bf2_ref, f2_ref):
    """fcn BN (folded) + ReLU, then fcn conv2."""
    f = jnp.maximum(f1_ref[...] * s2_ref[...] + t2_ref[...], 0.0)
    f2_ref[...] = (jnp.dot(f, wf2_t_ref[...], preferred_element_type=jnp.float32)
                   + bf2_ref[...])


def _resid_kernel(f2_ref, s3_ref, t3_ref, y_ref, o_ref):
    """Final fcn BN (folded) + residual add."""
    o_ref[...] = f2_ref[...] * s3_ref[...] + t3_ref[...] + y_ref[...]


_COMPILER_PARAMS = pltpu.CompilerParams(
    dimension_semantics=("parallel",),          # v7x: split row tiles across TCs
    vmem_limit_bytes=32 * 1024 * 1024,          # sized against v7x's smaller VMEM
)


def _full_spec(arr):
    # Whole-array VMEM block; constant index_map => stays resident across tiles.
    return pl.BlockSpec(arr.shape, lambda i: (0,) * arr.ndim)


def _bn_affine(v, gamma, beta):
    """Fold training-mode BatchNorm1d into a per-channel (1, C) scale/shift.

    Single-pass statistics: var = E[x^2] - mean^2 (biased), eps = 1e-5.
    Statistics are global over all N node rows -- computed here between the
    row-tiled kernels so tiling never changes the BN semantics.
    """
    m = jnp.mean(v, axis=0, keepdims=True)
    ms = jnp.mean(v * v, axis=0, keepdims=True)
    var = jnp.maximum(ms - m * m, 0.0)
    scale = gamma * jax.lax.rsqrt(var + BN_EPS)
    shift = beta - m * scale
    return scale, shift


# ----------------------------------------------------------------------------
# One GCN layer = 4 row-tiled pallas_calls + tiny BN-stat reductions between
# ----------------------------------------------------------------------------
def _gcn_layer(a16, x, pk, tn):
    n = x.shape[0]
    cin_p, cout_p = pk["wg_t"].shape
    grid = (pl.cdiv(n, tn),)
    x16 = x.astype(jnp.bfloat16)

    a_spec = pl.BlockSpec((tn, n), lambda i: (i, 0))
    row_in = pl.BlockSpec((tn, cin_p), lambda i: (i, 0))
    row_out = pl.BlockSpec((tn, cout_p), lambda i: (i, 0))
    out_f32 = jax.ShapeDtypeStruct((n, cout_p), jnp.float32)

    # ---- aggregation + grouped conv1d + fc_res -------------------------------
    h, r = pl.pallas_call(
        _agg_kernel,
        grid=grid,
        in_specs=[a_spec, _full_spec(x16), row_in,
                  _full_spec(pk["wg_t"]), _full_spec(pk["bg"]),
                  _full_spec(pk["wc1_t"]), _full_spec(pk["bc1"]),
                  _full_spec(pk["wr_t"]), _full_spec(pk["br"])],
        out_specs=(row_out, row_out),
        out_shape=(out_f32, out_f32),
        compiler_params=_COMPILER_PARAMS,
    )(a16, x16, x, pk["wg_t"], pk["bg"], pk["wc1_t"], pk["bc1"],
      pk["wr_t"], pk["br"])

    s1, t1 = _bn_affine(h, pk["g1"], pk["be1"])          # batch_norms_conv1d

    # ---- BN + residual add, fcn conv1 ---------------------------------------
    y, f1 = pl.pallas_call(
        _mid_kernel,
        grid=grid,
        in_specs=[row_out, row_out, _full_spec(s1), _full_spec(t1),
                  _full_spec(pk["wf1_t"]), _full_spec(pk["bf1"])],
        out_specs=(row_out, row_out),
        out_shape=(out_f32, out_f32),
        compiler_params=_COMPILER_PARAMS,
    )(h, r, s1, t1, pk["wf1_t"], pk["bf1"])

    s2, t2 = _bn_affine(f1, pk["gf1"], pk["bef1"])       # fcn BN #1

    # ---- BN + ReLU, fcn conv2 -------------------------------------------------
    f2 = pl.pallas_call(
        _fcn2_kernel,
        grid=grid,
        in_specs=[row_out, _full_spec(s2), _full_spec(t2),
                  _full_spec(pk["wf2_t"]), _full_spec(pk["bf2"])],
        out_specs=row_out,
        out_shape=out_f32,
        compiler_params=_COMPILER_PARAMS,
    )(f1, s2, t2, pk["wf2_t"], pk["bf2"])

    s3, t3 = _bn_affine(f2, pk["gf2"], pk["bef2"])       # fcn BN #2

    # ---- final BN + residual ---------------------------------------------------
    x_next = pl.pallas_call(
        _resid_kernel,
        grid=grid,
        in_specs=[row_out, _full_spec(s3), _full_spec(t3), row_out],
        out_specs=row_out,
        out_shape=out_f32,
        compiler_params=_COMPILER_PARAMS,
    )(f2, s3, t3, y)

    return x_next


# ----------------------------------------------------------------------------
# Plain-JAX glue: adjacency, parameter init, channel padding / pre-transpose
# ----------------------------------------------------------------------------
def build_normalized_adj(edge_index, num_nodes):
    """Dense D^-1/2 (A + I) D^-1/2 with A[t, s] = 1 for edge s -> t."""
    src = edge_index[0]
    dst = edge_index[1]
    loop = jnp.arange(num_nodes, dtype=src.dtype)
    src = jnp.concatenate([src, loop])
    dst = jnp.concatenate([dst, loop])
    adj = jnp.zeros((num_nodes, num_nodes), jnp.float32).at[dst, src].add(1.0)
    deg = jnp.sum(adj, axis=1)
    d_inv_sqrt = jnp.where(deg > 0, 1.0 / jnp.sqrt(deg), 0.0)
    return d_inv_sqrt[:, None] * adj * d_inv_sqrt[None, :]


def init_layer_params(key, c_in, c_out, num_heads):
    """Logical (unpadded, torch-layout) parameters for one layer."""
    ks = jax.random.split(key, 16)

    def nrm(k, shape, scale=0.1):
        return (jax.random.normal(k, shape) * scale).astype(jnp.float32)

    # grouped Conv1d(c_out, c_out, 1, groups=c_out // num_heads):
    # torch weight shape (c_out, num_heads, 1) -> dense block-diagonal matrix
    n_groups = c_out // num_heads
    wc1_grouped = nrm(ks[2], (c_out, num_heads))
    blocks = [wc1_grouped[g * num_heads:(g + 1) * num_heads, :] for g in range(n_groups)]
    wc1_dense = jax.scipy.linalg.block_diag(*blocks).astype(jnp.float32)

    row = lambda k, c: nrm(k, (1, c))
    return {
        "wg": nrm(ks[0], (c_out, c_in)), "bg": row(ks[1], c_out),
        "wc1": wc1_dense, "bc1": row(ks[3], c_out),
        "g1": nrm(ks[4], (1, c_out), 1.0) + 1.0, "be1": row(ks[5], c_out),
        "wr": nrm(ks[6], (c_out, c_in)), "br": row(ks[7], c_out),
        "wf1": nrm(ks[8], (c_out, c_out)), "bf1": row(ks[9], c_out),
        "gf1": nrm(ks[10], (1, c_out), 1.0) + 1.0, "bef1": row(ks[11], c_out),
        "wf2": nrm(ks[12], (c_out, c_out)), "bf2": row(ks[13], c_out),
        "gf2": nrm(ks[14], (1, c_out), 1.0) + 1.0, "bef2": row(ks[15], c_out),
    }


def _pack_layer_params(p):
    """Pad channels to 128 lanes and pre-transpose weights for the kernels.

    Zero padding of weights / biases / gamma / beta keeps the padded lanes
    identically zero through the whole layer, so they never leak into the
    real channels or the BatchNorm statistics.
    """
    c_out, c_in = p["wg"].shape
    cin_p = _round_up(c_in, LANE)
    cout_p = _round_up(c_out, LANE)

    def w_in_t(w):   # (c_out, c_in)  -> padded (cin_p, cout_p), transposed
        return jnp.pad(w.T, ((0, cin_p - c_in), (0, cout_p - c_out)))

    def w_sq_t(w):   # (c_out, c_out) -> padded (cout_p, cout_p), transposed
        return jnp.pad(w.T, ((0, cout_p - c_out), (0, cout_p - c_out)))

    def row(v):      # (1, c_out) -> (1, cout_p)
        return jnp.pad(v, ((0, 0), (0, cout_p - v.shape[1])))

    return {
        "wg_t": w_in_t(p["wg"]), "bg": row(p["bg"]),
        "wc1_t": w_sq_t(p["wc1"]), "bc1": row(p["bc1"]),
        "wr_t": w_in_t(p["wr"]), "br": row(p["br"]),
        "g1": row(p["g1"]), "be1": row(p["be1"]),
        "wf1_t": w_sq_t(p["wf1"]), "bf1": row(p["bf1"]),
        "gf1": row(p["gf1"]), "bef1": row(p["bef1"]),
        "wf2_t": w_sq_t(p["wf2"]), "bf2": row(p["bf2"]),
        "gf2": row(p["gf2"]), "bef2": row(p["bef2"]),
    }


@functools.partial(jax.jit, static_argnames=("num_nodes",))
def gcn_forward(x, edge_index, layer_params, num_nodes):
    # TODO(synk): keep A_hat resident across layers in one fused pallas_call;
    # blocked by the global-over-nodes BatchNorm statistics, which require a
    # cross-tile reduction between the in-layer matmuls.
    a16 = build_normalized_adj(edge_index, num_nodes).astype(jnp.bfloat16)
    tn = _choose_tn(num_nodes)

    c_in0 = x.shape[1]
    x = jnp.pad(x, ((0, 0), (0, _round_up(c_in0, LANE) - c_in0)))
    c_out = c_in0
    for p in layer_params:
        c_out = p["wg"].shape[0]
        x = _gcn_layer(a16, x, _pack_layer_params(p), tn)
    return x[:, :c_out]


# ----------------------------------------------------------------------------
# Pure-JAX reference mirroring the kernel math (for the sanity check):
# same bf16 cast for the adjacency aggregation (the kernels' deliberate
# precision relaxation), same reassociated (A @ X) @ Wg^T, same single-pass
# BatchNorm variance; f32 matmuls run at HIGHEST precision.
# ----------------------------------------------------------------------------
def gcn_forward_ref(x, edge_index, layer_params, num_nodes):
    a16 = build_normalized_adj(edge_index, num_nodes).astype(jnp.bfloat16)

    def dot(u, v):
        return jnp.dot(u, v, precision=HI, preferred_element_type=jnp.float32)

    for p in layer_params:
        ax = dot(a16, x.astype(jnp.bfloat16))
        h = jax.nn.relu(dot(ax, p["wg"].T) + p["bg"])
        h = dot(h, p["wc1"].T) + p["bc1"]
        s, t = _bn_affine(h, p["g1"], p["be1"])
        h = h * s + t
        r = dot(x, p["wr"].T) + p["br"]
        y = h + r
        f = dot(y, p["wf1"].T) + p["bf1"]
        s, t = _bn_affine(f, p["gf1"], p["bef1"])
        f = jax.nn.relu(f * s + t)
        f = dot(f, p["wf2"].T) + p["bf2"]
        s, t = _bn_affine(f, p["gf2"], p["bef2"])
        f = f * s + t
        x = f + y
    return x


if __name__ == "__main__":
    key = jax.random.PRNGKey(0)

    hidden_dim, num_layers, num_heads = 32, 2, 4
    num_nodes, num_edges = 16, 48

    k_x, k_e, k_p = jax.random.split(key, 3)
    x = jax.random.normal(k_x, (num_nodes, hidden_dim), dtype=jnp.float32)
    edge_index = jax.random.randint(k_e, (2, num_edges), 0, num_nodes, dtype=jnp.int32)

    layer_params = []
    keys = jax.random.split(k_p, num_layers)
    for i in range(num_layers):
        c_in = hidden_dim // (2 ** i)
        c_out = hidden_dim // (2 ** (i + 1))
        layer_params.append(init_layer_params(keys[i], c_in, c_out, num_heads))
    layer_params = tuple(layer_params)

    out = gcn_forward(x, edge_index, layer_params, num_nodes)
    out = jax.block_until_ready(out)

    ref = gcn_forward_ref(x, edge_index, layer_params, num_nodes)
    np.testing.assert_allclose(np.asarray(out), np.asarray(ref), rtol=1e-2, atol=1e-2)

    assert out.shape == (num_nodes, hidden_dim // (2 ** num_layers))
    print("KERNEL_OK")
</pallas_src>

<mosaic_0001>
module attributes {stable_mosaic.version = 11 : i64} {
  func.func private @main(%arg0: i32) attributes {dimension_semantics = [#tpu.dimension_semantics<core_parallel>], iteration_bounds = array<i64: 2>, tpu.core_type = #tpu.core_type<sc_scalar_subcore>, window_params = []} {
    return
  }
}

module attributes {stable_mosaic.version = 11 : i64} {
  func.func private @main(%arg0: i32) attributes {dimension_semantics = [#tpu.dimension_semantics<core_parallel>], iteration_bounds = array<i64: 2>, tpu.core_type = #tpu.core_type<sc_scalar_subcore>, window_params = []} {
    return
  }
}

module attributes {stable_mosaic.version = 11 : i64} {
  func.func @_mid_kernel(%arg0: i32, %arg1: memref<16x128xf32, #tpu.memory_space<vmem>>, %arg2: memref<16x128xf32, #tpu.memory_space<vmem>>, %arg3: memref<1x128xf32, #tpu.memory_space<vmem>>, %arg4: memref<1x128xf32, #tpu.memory_space<vmem>>, %arg5: memref<128x128xf32, #tpu.memory_space<vmem>>, %arg6: memref<1x128xf32, #tpu.memory_space<vmem>>, %arg7: memref<16x128xf32, #tpu.memory_space<vmem>>, %arg8: memref<16x128xf32, #tpu.memory_space<vmem>>) attributes {dimension_semantics = [#tpu.dimension_semantics<parallel>], iteration_bounds = array<i64: 1>, scalar_prefetch = 0 : i64, scratch_operands = 0 : i64, tpu.core_type = #tpu.core_type<tc>, window_params = [{transform_indices = @transform_0, window_bounds = array<i64: 16, 128>}, {transform_indices = @transform_1, window_bounds = array<i64: 16, 128>}, {pipeline_mode = #tpu.pipeline_mode<synchronous>, transform_indices = @transform_2, window_bounds = array<i64: 1, 128>}, {pipeline_mode = #tpu.pipeline_mode<synchronous>, transform_indices = @transform_3, window_bounds = array<i64: 1, 128>}, {pipeline_mode = #tpu.pipeline_mode<synchronous>, transform_indices = @transform_4, window_bounds = array<i64: 128, 128>}, {pipeline_mode = #tpu.pipeline_mode<synchronous>, transform_indices = @transform_5, window_bounds = array<i64: 1, 128>}, {transform_indices = @transform_6, window_bounds = array<i64: 16, 128>}, {transform_indices = @transform_7, window_bounds = array<i64: 16, 128>}]} {
    %c0 = arith.constant 0 : index
    %c0_0 = arith.constant 0 : index
    %0 = vector.load %arg1[%c0, %c0_0] : memref<16x128xf32, #tpu.memory_space<vmem>>, vector<16x128xf32>
    %c0_1 = arith.constant 0 : index
    %c0_2 = arith.constant 0 : index
    %1 = vector.load %arg3[%c0_1, %c0_2] : memref<1x128xf32, #tpu.memory_space<vmem>>, vector<1x128xf32>
    %2 = vector.broadcast %1 : vector<1x128xf32> to vector<16x128xf32>
    %3 = arith.mulf %0, %2 : vector<16x128xf32>
    %c0_3 = arith.constant 0 : index
    %c0_4 = arith.constant 0 : index
    %4 = vector.load %arg4[%c0_3, %c0_4] : memref<1x128xf32, #tpu.memory_space<vmem>>, vector<1x128xf32>
    %5 = vector.broadcast %4 : vector<1x128xf32> to vector<16x128xf32>
    %6 = arith.addf %3, %5 : vector<16x128xf32>
    %c0_5 = arith.constant 0 : index
    %c0_6 = arith.constant 0 : index
    %7 = vector.load %arg2[%c0_5, %c0_6] : memref<16x128xf32, #tpu.memory_space<vmem>>, vector<16x128xf32>
    %8 = arith.addf %6, %7 : vector<16x128xf32>
    %c0_7 = arith.constant 0 : index
    %c0_8 = arith.constant 0 : index
    %9 = vector.load %arg7[%c0_7, %c0_8] : memref<16x128xf32, #tpu.memory_space<vmem>>, vector<16x128xf32>
    tpu.vector_store %arg7[%c0_7, %c0_8], %8 {strides = array<i32>} : memref<16x128xf32, #tpu.memory_space<vmem>>, vector<16x128xf32>,
    %c0_9 = arith.constant 0 : index
    %c0_10 = arith.constant 0 : index
    %10 = vector.load %arg5[%c0_9, %c0_10] : memref<128x128xf32, #tpu.memory_space<vmem>>, vector<128x128xf32>
    %cst = arith.constant dense<0.000000e+00> : vector<16x128xf32>
    %11 = tpu.matmul %8, %10, %cst {dimension_numbers = #tpu.dot_dimension_numbers<[1], [0], [0], [1], [0, 0, 1, 1], [], []>} : vector<16x128xf32>, vector<128x128xf32>, vector<16x128xf32> -> vector<16x128xf32>
    %c0_11 = arith.constant 0 : index
    %c0_12 = arith.constant 0 : index
    %12 = vector.load %arg6[%c0_11, %c0_12] : memref<1x128xf32, #tpu.memory_space<vmem>>, vector<1x128xf32>
    %13 = vector.broadcast %12 : vector<1x128xf32> to vector<16x128xf32>
    %14 = arith.addf %11, %13 : vector<16x128xf32>
    %c0_13 = arith.constant 0 : index
    %c0_14 = arith.constant 0 : index
    %15 = vector.load %arg8[%c0_13, %c0_14] : memref<16x128xf32, #tpu.memory_space<vmem>>, vector<16x128xf32>
    tpu.vector_store %arg8[%c0_13, %c0_14], %14 {strides = array<i32>} : memref<16x128xf32, #tpu.memory_space<vmem>>, vector<16x128xf32>,
    return
  }
  func.func @transform_0(%arg0: i32) -> (i32, i32) {
    %c0_i32 = arith.constant 0 : i32
    %c0_i32_0 = arith.constant 0 : i32
    return %arg0, %c0_i32 : i32, i32
  }
  func.func @transform_1(%arg0: i32) -> (i32, i32) {
    %c0_i32 = arith.constant 0 : i32
    %c0_i32_0 = arith.constant 0 : i32
    return %arg0, %c0_i32 : i32, i32
  }
  func.func @transform_2(%arg0: i32) -> (i32, i32) {
    %c0_i32 = arith.constant 0 : i32
    %c0_i32_0 = arith.constant 0 : i32
    %c0_i32_1 = arith.constant 0 : i32
    return %c0_i32, %c0_i32_0 : i32, i32
  }
  func.func @transform_3(%arg0: i32) -> (i32, i32) {
    %c0_i32 = arith.constant 0 : i32
    %c0_i32_0 = arith.constant 0 : i32
    %c0_i32_1 = arith.constant 0 : i32
    return %c0_i32, %c0_i32_0 : i32, i32
  }
  func.func @transform_4(%arg0: i32) -> (i32, i32) {
    %c0_i32 = arith.constant 0 : i32
    %c0_i32_0 = arith.constant 0 : i32
    %c0_i32_1 = arith.constant 0 : i32
    return %c0_i32, %c0_i32_0 : i32, i32
  }
  func.func @transform_5(%arg0: i32) -> (i32, i32) {
    %c0_i32 = arith.constant 0 : i32
    %c0_i32_0 = arith.constant 0 : i32
    %c0_i32_1 = arith.constant 0 : i32
    return %c0_i32, %c0_i32_0 : i32, i32
  }
  func.func @transform_6(%arg0: i32) -> (i32, i32) {
    %c0_i32 = arith.constant 0 : i32
    %c0_i32_0 = arith.constant 0 : i32
    return %arg0, %c0_i32 : i32, i32
  }
  func.func @transform_7(%arg0: i32) -> (i32, i32) {
    %c0_i32 = arith.constant 0 : i32
    %c0_i32_0 = arith.constant 0 : i32
    return %arg0, %c0_i32 : i32, i32
  }
}

module attributes {stable_mosaic.version = 11 : i64} {
  func.func @_agg_kernel(%arg0: i32, %arg1: memref<16x16xbf16, #tpu.memory_space<vmem>>, %arg2: memref<16x128xbf16, #tpu.memory_space<vmem>>, %arg3: memref<16x128xf32, #tpu.memory_space<vmem>>, %arg4: memref<128x128xf32, #tpu.memory_space<vmem>>, %arg5: memref<1x128xf32, #tpu.memory_space<vmem>>, %arg6: memref<128x128xf32, #tpu.memory_space<vmem>>, %arg7: memref<1x128xf32, #tpu.memory_space<vmem>>, %arg8: memref<128x128xf32, #tpu.memory_space<vmem>>, %arg9: memref<1x128xf32, #tpu.memory_space<vmem>>, %arg10: memref<16x128xf32, #tpu.memory_space<vmem>>, %arg11: memref<16x128xf32, #tpu.memory_space<vmem>>) attributes {dimension_semantics = [#tpu.dimension_semantics<parallel>], iteration_bounds = array<i64: 1>, scalar_prefetch = 0 : i64, scratch_operands = 0 : i64, tpu.core_type = #tpu.core_type<tc>, window_params = [{transform_indices = @transform_0, window_bounds = array<i64: 16, 16>}, {pipeline_mode = #tpu.pipeline_mode<synchronous>, transform_indices = @transform_1, window_bounds = array<i64: 16, 128>}, {transform_indices = @transform_2, window_bounds = array<i64: 16, 128>}, {pipeline_mode = #tpu.pipeline_mode<synchronous>, transform_indices = @transform_3, window_bounds = array<i64: 128, 128>}, {pipeline_mode = #tpu.pipeline_mode<synchronous>, transform_indices = @transform_4, window_bounds = array<i64: 1, 128>}, {pipeline_mode = #tpu.pipeline_mode<synchronous>, transform_indices = @transform_5, window_bounds = array<i64: 128, 128>}, {pipeline_mode = #tpu.pipeline_mode<synchronous>, transform_indices = @transform_6, window_bounds = array<i64: 1, 128>}, {pipeline_mode = #tpu.pipeline_mode<synchronous>, transform_indices = @transform_7, window_bounds = array<i64: 128, 128>}, {pipeline_mode = #tpu.pipeline_mode<synchronous>, transform_indices = @transform_8, window_bounds = array<i64: 1, 128>}, {transform_indices = @transform_9, window_bounds = array<i64: 16, 128>}, {transform_indices = @transform_10, window_bounds = array<i64: 16, 128>}]} {
    %c0 = arith.constant 0 : index
    %c0_0 = arith.constant 0 : index
    %0 = vector.load %arg1[%c0, %c0_0] : memref<16x16xbf16, #tpu.memory_space<vmem>>, vector<16x16xbf16>
    %c0_1 = arith.constant 0 : index
    %c0_2 = arith.constant 0 : index
    %1 = vector.load %arg2[%c0_1, %c0_2] : memref<16x128xbf16, #tpu.memory_space<vmem>>, vector<16x128xbf16>
    %cst = arith.constant dense<0.000000e+00> : vector<16x128xf32>
    %2 = tpu.matmul %0, %1, %cst {dimension_numbers = #tpu.dot_dimension_numbers<[1], [0], [0], [1], [0, 0, 1, 1], [], []>} : vector<16x16xbf16>, vector<16x128xbf16>, vector<16x128xf32> -> vector<16x128xf32>
    %c0_3 = arith.constant 0 : index
    %c0_4 = arith.constant 0 : index
    %3 = vector.load %arg4[%c0_3, %c0_4] : memref<128x128xf32, #tpu.memory_space<vmem>>, vector<128x128xf32>
    %cst_5 = arith.constant dense<0.000000e+00> : vector<16x128xf32>
    %4 = tpu.matmul %2, %3, %cst_5 {dimension_numbers = #tpu.dot_dimension_numbers<[1], [0], [0], [1], [0, 0, 1, 1], [], []>} : vector<16x128xf32>, vector<128x128xf32>, vector<16x128xf32> -> vector<16x128xf32>
    %c0_6 = arith.constant 0 : index
    %c0_7 = arith.constant 0 : index
    %5 = vector.load %arg5[%c0_6, %c0_7] : memref<1x128xf32, #tpu.memory_space<vmem>>, vector<1x128xf32>
    %6 = vector.broadcast %5 : vector<1x128xf32> to vector<16x128xf32>
    %7 = arith.addf %4, %6 : vector<16x128xf32>
    %cst_8 = arith.constant 0.000000e+00 : f32
    %8 = vector.broadcast %cst_8 : f32 to vector<16x128xf32>
    %9 = arith.maximumf %7, %8 : vector<16x128xf32>
    %c0_9 = arith.constant 0 : index
    %c0_10 = arith.constant 0 : index
    %10 = vector.load %arg6[%c0_9, %c0_10] : memref<128x128xf32, #tpu.memory_space<vmem>>, vector<128x128xf32>
    %cst_11 = arith.constant dense<0.000000e+00> : vector<16x128xf32>
    %11 = tpu.matmul %9, %10, %cst_11 {dimension_numbers = #tpu.dot_dimension_numbers<[1], [0], [0], [1], [0, 0, 1, 1], [], []>} : vector<16x128xf32>, vector<128x128xf32>, vector<16x128xf32> -> vector<16x128xf32>
    %c0_12 = arith.constant 0 : index
    %c0_13 = arith.constant 0 : index
    %12 = vector.load %arg7[%c0_12, %c0_13] : memref<1x128xf32, #tpu.memory_space<vmem>>, vector<1x128xf32>
    %13 = vector.broadcast %12 : vector<1x128xf32> to vector<16x128xf32>
    %14 = arith.addf %11, %13 : vector<16x128xf32>
    %c0_14 = arith.constant 0 : index
    %c0_15 = arith.constant 0 : index
    %15 = vector.load %arg10[%c0_14, %c0_15] : memref<16x128xf32, #tpu.memory_space<vmem>>, vector<16x128xf32>
    tpu.vector_store %arg10[%c0_14, %c0_15], %14 {strides = array<i32>} : memref<16x128xf32, #tpu.memory_space<vmem>>, vector<16x128xf32>,
    %c0_16 = arith.constant 0 : index
    %c0_17 = arith.constant 0 : index
    %16 = vector.load %arg3[%c0_16, %c0_17] : memref<16x128xf32, #tpu.memory_space<vmem>>, vector<16x128xf32>
    %c0_18 = arith.constant 0 : index
    %c0_19 = arith.constant 0 : index
    %17 = vector.load %arg8[%c0_18, %c0_19] : memref<128x128xf32, #tpu.memory_space<vmem>>, vector<128x128xf32>
    %cst_20 = arith.constant dense<0.000000e+00> : vector<16x128xf32>
    %18 = tpu.matmul %16, %17, %cst_20 {dimension_numbers = #tpu.dot_dimension_numbers<[1], [0], [0], [1], [0, 0, 1, 1], [], []>} : vector<16x128xf32>, vector<128x128xf32>, vector<16x128xf32> -> vector<16x128xf32>
    %c0_21 = arith.constant 0 : index
    %c0_22 = arith.constant 0 : index
    %19 = vector.load %arg9[%c0_21, %c0_22] : memref<1x128xf32, #tpu.memory_space<vmem>>, vector<1x128xf32>
    %20 = vector.broadcast %19 : vector<1x128xf32> to vector<16x128xf32>
    %21 = arith.addf %18, %20 : vector<16x128xf32>
    %c0_23 = arith.constant 0 : index
    %c0_24 = arith.constant 0 : index
    %22 = vector.load %arg11[%c0_23, %c0_24] : memref<16x128xf32, #tpu.memory_space<vmem>>, vector<16x128xf32>
    tpu.vector_store %arg11[%c0_23, %c0_24], %21 {strides = array<i32>} : memref<16x128xf32, #tpu.memory_space<vmem>>, vector<16x128xf32>,
    return
  }
  func.func @transform_0(%arg0: i32) -> (i32, i32) {
    %c0_i32 = arith.constant 0 : i32
    %c0_i32_0 = arith.constant 0 : i32
    return %arg0, %c0_i32 : i32, i32
  }
  func.func @transform_1(%arg0: i32) -> (i32, i32) {
    %c0_i32 = arith.constant 0 : i32
    %c0_i32_0 = arith.constant 0 : i32
    %c0_i32_1 = arith.constant 0 : i32
    return %c0_i32, %c0_i32_0 : i32, i32
  }
  func.func @transform_2(%arg0: i32) -> (i32, i32) {
    %c0_i32 = arith.constant 0 : i32
    %c0_i32_0 = arith.constant 0 : i32
    return %arg0, %c0_i32 : i32, i32
  }
  func.func @transform_3(%arg0: i32) -> (i32, i32) {
    %c0_i32 = arith.constant 0 : i32
    %c0_i32_0 = arith.constant 0 : i32
    %c0_i32_1 = arith.constant 0 : i32
    return %c0_i32, %c0_i32_0 : i32, i32
  }
  func.func @transform_4(%arg0: i32) -> (i32, i32) {
    %c0_i32 = arith.constant 0 : i32
    %c0_i32_0 = arith.constant 0 : i32
    %c0_i32_1 = arith.constant 0 : i32
    return %c0_i32, %c0_i32_0 : i32, i32
  }
  func.func @transform_5(%arg0: i32) -> (i32, i32) {
    %c0_i32 = arith.constant 0 : i32
    %c0_i32_0 = arith.constant 0 : i32
    %c0_i32_1 = arith.constant 0 : i32
    return %c0_i32, %c0_i32_0 : i32, i32
  }
  func.func @transform_6(%arg0: i32) -> (i32, i32) {
    %c0_i32 = arith.constant 0 : i32
    %c0_i32_0 = arith.constant 0 : i32
    %c0_i32_1 = arith.constant 0 : i32
    return %c0_i32, %c0_i32_0 : i32, i32
  }
  func.func @transform_7(%arg0: i32) -> (i32, i32) {
    %c0_i32 = arith.constant 0 : i32
    %c0_i32_0 = arith.constant 0 : i32
    %c0_i32_1 = arith.constant 0 : i32
    return %c0_i32, %c0_i32_0 : i32, i32
  }
  func.func @transform_8(%arg0: i32) -> (i32, i32) {
    %c0_i32 = arith.constant 0 : i32
    %c0_i32_0 = arith.constant 0 : i32
    %c0_i32_1 = arith.constant 0 : i32
    return %c0_i32, %c0_i32_0 : i32, i32
  }
  func.func @transform_9(%arg0: i32) -> (i32, i32) {
    %c0_i32 = arith.constant 0 : i32
    %c0_i32_0 = arith.constant 0 : i32
    return %arg0, %c0_i32 : i32, i32
  }
  func.func @transform_10(%arg0: i32) -> (i32, i32) {
    %c0_i32 = arith.constant 0 : i32
    %c0_i32_0 = arith.constant 0 : i32
    return %arg0, %c0_i32 : i32, i32
  }
}

module attributes {stable_mosaic.version = 11 : i64} {
  func.func @_fcn2_kernel(%arg0: i32, %arg1: memref<16x128xf32, #tpu.memory_space<vmem>>, %arg2: memref<1x128xf32, #tpu.memory_space<vmem>>, %arg3: memref<1x128xf32, #tpu.memory_space<vmem>>, %arg4: memref<128x128xf32, #tpu.memory_space<vmem>>, %arg5: memref<1x128xf32, #tpu.memory_space<vmem>>, %arg6: memref<16x128xf32, #tpu.memory_space<vmem>>) attributes {dimension_semantics = [#tpu.dimension_semantics<parallel>], iteration_bounds = array<i64: 1>, scalar_prefetch = 0 : i64, scratch_operands = 0 : i64, tpu.core_type = #tpu.core_type<tc>, window_params = [{transform_indices = @transform_0, window_bounds = array<i64: 16, 128>}, {pipeline_mode = #tpu.pipeline_mode<synchronous>, transform_indices = @transform_1, window_bounds = array<i64: 1, 128>}, {pipeline_mode = #tpu.pipeline_mode<synchronous>, transform_indices = @transform_2, window_bounds = array<i64: 1, 128>}, {pipeline_mode = #tpu.pipeline_mode<synchronous>, transform_indices = @transform_3, window_bounds = array<i64: 128, 128>}, {pipeline_mode = #tpu.pipeline_mode<synchronous>, transform_indices = @transform_4, window_bounds = array<i64: 1, 128>}, {transform_indices = @transform_5, window_bounds = array<i64: 16, 128>}]} {
    %c0 = arith.constant 0 : index
    %c0_0 = arith.constant 0 : index
    %0 = vector.load %arg1[%c0, %c0_0] : memref<16x128xf32, #tpu.memory_space<vmem>>, vector<16x128xf32>
    %c0_1 = arith.constant 0 : index
    %c0_2 = arith.constant 0 : index
    %1 = vector.load %arg2[%c0_1, %c0_2] : memref<1x128xf32, #tpu.memory_space<vmem>>, vector<1x128xf32>
    %2 = vector.broadcast %1 : vector<1x128xf32> to vector<16x128xf32>
    %3 = arith.mulf %0, %2 : vector<16x128xf32>
    %c0_3 = arith.constant 0 : index
    %c0_4 = arith.constant 0 : index
    %4 = vector.load %arg3[%c0_3, %c0_4] : memref<1x128xf32, #tpu.memory_space<vmem>>, vector<1x128xf32>
    %5 = vector.broadcast %4 : vector<1x128xf32> to vector<16x128xf32>
    %6 = arith.addf %3, %5 : vector<16x128xf32>
    %cst = arith.constant 0.000000e+00 : f32
    %7 = vector.broadcast %cst : f32 to vector<16x128xf32>
    %8 = arith.maximumf %6, %7 : vector<16x128xf32>
    %c0_5 = arith.constant 0 : index
    %c0_6 = arith.constant 0 : index
    %9 = vector.load %arg4[%c0_5, %c0_6] : memref<128x128xf32, #tpu.memory_space<vmem>>, vector<128x128xf32>
    %cst_7 = arith.constant dense<0.000000e+00> : vector<16x128xf32>
    %10 = tpu.matmul %8, %9, %cst_7 {dimension_numbers = #tpu.dot_dimension_numbers<[1], [0], [0], [1], [0, 0, 1, 1], [], []>} : vector<16x128xf32>, vector<128x128xf32>, vector<16x128xf32> -> vector<16x128xf32>
    %c0_8 = arith.constant 0 : index
    %c0_9 = arith.constant 0 : index
    %11 = vector.load %arg5[%c0_8, %c0_9] : memref<1x128xf32, #tpu.memory_space<vmem>>, vector<1x128xf32>
    %12 = vector.broadcast %11 : vector<1x128xf32> to vector<16x128xf32>
    %13 = arith.addf %10, %12 : vector<16x128xf32>
    %c0_10 = arith.constant 0 : index
    %c0_11 = arith.constant 0 : index
    %14 = vector.load %arg6[%c0_10, %c0_11] : memref<16x128xf32, #tpu.memory_space<vmem>>, vector<16x128xf32>
    tpu.vector_store %arg6[%c0_10, %c0_11], %13 {strides = array<i32>} : memref<16x128xf32, #tpu.memory_space<vmem>>, vector<16x128xf32>,
    return
  }
  func.func @transform_0(%arg0: i32) -> (i32, i32) {
    %c0_i32 = arith.constant 0 : i32
    %c0_i32_0 = arith.constant 0 : i32
    return %arg0, %c0_i32 : i32, i32
  }
  func.func @transform_1(%arg0: i32) -> (i32, i32) {
    %c0_i32 = arith.constant 0 : i32
    %c0_i32_0 = arith.constant 0 : i32
    %c0_i32_1 = arith.constant 0 : i32
    return %c0_i32, %c0_i32_0 : i32, i32
  }
  func.func @transform_2(%arg0: i32) -> (i32, i32) {
    %c0_i32 = arith.constant 0 : i32
    %c0_i32_0 = arith.constant 0 : i32
    %c0_i32_1 = arith.constant 0 : i32
    return %c0_i32, %c0_i32_0 : i32, i32
  }
  func.func @transform_3(%arg0: i32) -> (i32, i32) {
    %c0_i32 = arith.constant 0 : i32
    %c0_i32_0 = arith.constant 0 : i32
    %c0_i32_1 = arith.constant 0 : i32
    return %c0_i32, %c0_i32_0 : i32, i32
  }
  func.func @transform_4(%arg0: i32) -> (i32, i32) {
    %c0_i32 = arith.constant 0 : i32
    %c0_i32_0 = arith.constant 0 : i32
    %c0_i32_1 = arith.constant 0 : i32
    return %c0_i32, %c0_i32_0 : i32, i32
  }
  func.func @transform_5(%arg0: i32) -> (i32, i32) {
    %c0_i32 = arith.constant 0 : i32
    %c0_i32_0 = arith.constant 0 : i32
    return %arg0, %c0_i32 : i32, i32
  }
}

module attributes {stable_mosaic.version = 11 : i64} {
  func.func @_resid_kernel(%arg0: i32, %arg1: memref<16x128xf32, #tpu.memory_space<vmem>>, %arg2: memref<1x128xf32, #tpu.memory_space<vmem>>, %arg3: memref<1x128xf32, #tpu.memory_space<vmem>>, %arg4: memref<16x128xf32, #tpu.memory_space<vmem>>, %arg5: memref<16x128xf32, #tpu.memory_space<vmem>>) attributes {dimension_semantics = [#tpu.dimension_semantics<parallel>], iteration_bounds = array<i64: 1>, scalar_prefetch = 0 : i64, scratch_operands = 0 : i64, tpu.core_type = #tpu.core_type<tc>, window_params = [{transform_indices = @transform_0, window_bounds = array<i64: 16, 128>}, {pipeline_mode = #tpu.pipeline_mode<synchronous>, transform_indices = @transform_1, window_bounds = array<i64: 1, 128>}, {pipeline_mode = #tpu.pipeline_mode<synchronous>, transform_indices = @transform_2, window_bounds = array<i64: 1, 128>}, {transform_indices = @transform_3, window_bounds = array<i64: 16, 128>}, {transform_indices = @transform_4, window_bounds = array<i64: 16, 128>}]} {
    %c0 = arith.constant 0 : index
    %c0_0 = arith.constant 0 : index
    %0 = vector.load %arg1[%c0, %c0_0] : memref<16x128xf32, #tpu.memory_space<vmem>>, vector<16x128xf32>
    %c0_1 = arith.constant 0 : index
    %c0_2 = arith.constant 0 : index
    %1 = vector.load %arg2[%c0_1, %c0_2] : memref<1x128xf32, #tpu.memory_space<vmem>>, vector<1x128xf32>
    %2 = vector.broadcast %1 : vector<1x128xf32> to vector<16x128xf32>
    %3 = arith.mulf %0, %2 : vector<16x128xf32>
    %c0_3 = arith.constant 0 : index
    %c0_4 = arith.constant 0 : index
    %4 = vector.load %arg3[%c0_3, %c0_4] : memref<1x128xf32, #tpu.memory_space<vmem>>, vector<1x128xf32>
    %5 = vector.broadcast %4 : vector<1x128xf32> to vector<16x128xf32>
    %6 = arith.addf %3, %5 : vector<16x128xf32>
    %c0_5 = arith.constant 0 : index
    %c0_6 = arith.constant 0 : index
    %7 = vector.load %arg4[%c0_5, %c0_6] : memref<16x128xf32, #tpu.memory_space<vmem>>, vector<16x128xf32>
    %8 = arith.addf %6, %7 : vector<16x128xf32>
    %c0_7 = arith.constant 0 : index
    %c0_8 = arith.constant 0 : index
    %9 = vector.load %arg5[%c0_7, %c0_8] : memref<16x128xf32, #tpu.memory_space<vmem>>, vector<16x128xf32>
    tpu.vector_store %arg5[%c0_7, %c0_8], %8 {strides = array<i32>} : memref<16x128xf32, #tpu.memory_space<vmem>>, vector<16x128xf32>,
    return
  }
  func.func @transform_0(%arg0: i32) -> (i32, i32) {
    %c0_i32 = arith.constant 0 : i32
    %c0_i32_0 = arith.constant 0 : i32
    return %arg0, %c0_i32 : i32, i32
  }
  func.func @transform_1(%arg0: i32) -> (i32, i32) {
    %c0_i32 = arith.constant 0 : i32
    %c0_i32_0 = arith.constant 0 : i32
    %c0_i32_1 = arith.constant 0 : i32
    return %c0_i32, %c0_i32_0 : i32, i32
  }
  func.func @transform_2(%arg0: i32) -> (i32, i32) {
    %c0_i32 = arith.constant 0 : i32
    %c0_i32_0 = arith.constant 0 : i32
    %c0_i32_1 = arith.constant 0 : i32
    return %c0_i32, %c0_i32_0 : i32, i32
  }
  func.func @transform_3(%arg0: i32) -> (i32, i32) {
    %c0_i32 = arith.constant 0 : i32
    %c0_i32_0 = arith.constant 0 : i32
    return %arg0, %c0_i32 : i32, i32
  }
  func.func @transform_4(%arg0: i32) -> (i32, i32) {
    %c0_i32 = arith.constant 0 : i32
    %c0_i32_0 = arith.constant 0 : i32
    return %arg0, %c0_i32 : i32, i32
  }
}

</mosaic_0001>

<bundles_post_ra>
// kernel: gcn_forward.9
= control target key start
LH: loop header
LB: loop body
LE: loop exit
PB: predicated region body
PF: predicated region fallthrough
CT: control target
= control target key end

     0   :  { %s368_s4 = inlined_call_operand.vmem [shape: f32[128,128], index: 4, kind: input, shape index: {}]   ;;  %s369_s0 = inlined_call_operand.vmem [shape: f32[16,128], index: 0, kind: input, shape index: {}]   ;;  %s370_s2 = inlined_call_operand.vmem [shape: f32[1,128], index: 2, kind: input, shape index: {}]   ;;  %s371_s3 = inlined_call_operand.vmem [shape: f32[1,128], index: 3, kind: input, shape index: {}]   ;;  %s372_s1 = inlined_call_operand.vmem [shape: f32[16,128], index: 1, kind: input, shape index: {}]   ;;  %s373_s6 = inlined_call_operand.vmem [shape: f32[16,128], index: 6, kind: output, shape index: {0}]   ;;  %s374_s5 = inlined_call_operand.vmem [shape: f32[1,128], index: 5, kind: input, shape index: {}]   ;;  %s375_s7 = inlined_call_operand.vmem [shape: f32[16,128], index: 7, kind: output, shape index: {1}]  }
   0x1   :  { %v51_v0 = vld [vmem:[%s368_s4] sm:$0xff]  ;;  %v52_v1 = vld [vmem:[%s368_s4 + $0x8] sm:$0xff]  ;;  %v53_v2 = vld [vmem:[%s368_s4 + $0x10] sm:$0xff] }
   0x2   :  { %v215_v3 = vpack.c.bf16 %v52_v1, %v51_v0  ;;  %v54_v4 = vld [vmem:[%s368_s4 + $0x18] sm:$0xff]  ;;  %v55_v6 = vld [vmem:[%s368_s4 + $0x20] sm:$0xff]  ;;  %v56_v7 = vld [vmem:[%s368_s4 + $0x28] sm:$0xff] }
   0x3   :  { %v219_v5 = vpack.c.bf16 %v54_v4, %v53_v2  ;;  %v223_v8 = vpack.c.bf16 %v56_v7, %v55_v6  ;;  %v57_v9 = vld [vmem:[%s368_s4 + $0x30] sm:$0xff]  ;;  %v25_v10 = vld [vmem:[%s369_s0] sm:$0xff]  ;;  %v26_v11 = vld [vmem:[%s369_s0 + $0x8] sm:$0xff] }
   0x4   :  { %216 = vmatprep.subr.bf16.mxu0 %v215_v3  ;;  %v58_v12 = vld [vmem:[%s368_s4 + $0x38] sm:$0xff]  ;;  %v159_v13 = vld [vmem:[%s370_s2] ss:$0 sm:$0xff]  ;;  %v46_v18 = vld [vmem:[%s372_s1 + $0x8] sm:$0xff] }
   0x5   :  { %218 = vmatpush3.bf16.msra.mxu0 %v215_v3  ;;  %v160_v14 = vld [vmem:[%s371_s3] ss:$0 sm:$0xff]  ;;  %v34_v15 = vmul.f32 %v159_v13, %v25_v10  ;;  %v35_v16 = vmul.f32 %v159_v13, %v26_v11  ;;  %v227_v19 = vpack.c.bf16 %v58_v12, %v57_v9  ;;  %v60_v23 = vld [vmem:[%s368_s4 + $0x48] sm:$0xff]  ;;  %v61_v27 = vld [vmem:[%s368_s4 + $0x50] sm:$0xff] }
   0x6   :  { %220 = vmatprep.subr.bf16.mxu0 %v219_v5  ;;  %v45_v17 = vld [vmem:[%s372_s1] sm:$0xff]  ;;  %v62_v28 = vld [vmem:[%s368_s4 + $0x58] sm:$0xff]  ;;  %v64_v31 = vld [vmem:[%s368_s4 + $0x68] sm:$0xff] }
   0x7   :  { %v43_v20 = vadd.f32 %v160_v14, %v34_v15  ;;  %v44_v21 = vadd.f32 %v160_v14, %v35_v16  ;;  %v59_v22 = vld [vmem:[%s368_s4 + $0x40] sm:$0xff]  ;;  %v235_v29 = vpack.c.bf16 %v62_v28, %v61_v27  ;;  %v65_v33 = vld [vmem:[%s368_s4 + $0x70] sm:$0xff]  ;;  %v66_v34 = vld [vmem:[%s368_s4 + $0x78] sm:$0xff] }
   0x8   :  { %v231_v26 = vpack.c.bf16 %v60_v23, %v59_v22  ;;  %v63_v30 = vld [vmem:[%s368_s4 + $0x60] sm:$0xff]  ;;  %v243_v35 = vpack.c.bf16 %v66_v34, %v65_v33 }
   0x9   :  { %222 = vmatpush3.bf16.msra.mxu0 %v219_v5  ;;  %v47_v24 = vadd.f32 %v45_v17, %v43_v20  ;;  %v48_v25 = vadd.f32 %v46_v18, %v44_v21  ;;  %v239_v32 = vpack.c.bf16 %v64_v31, %v63_v30  ;;  %v161_v36 = vld [vmem:[%s374_s5] ss:$0 sm:$0xff] }
   0xa   :  { %224 = vmatprep.subr.bf16.mxu0 %v223_v8 }
   0xb   :  { %49 = vst [vmem:[%s373_s6] sm:$0xff] %v47_v24  ;;  %212 = vmatprep.mubr.f32.mxu0 %v47_v24  ;;  %50 = vst [vmem:[%s373_s6 + $0x8] sm:$0xff] %v48_v25 }
   0xd   :  { %226 = vmatpush3.bf16.msra.mxu0 %v223_v8 }
   0xe   :  { %228 = vmatprep.subr.bf16.mxu0 %v227_v19 }
  0x11   :  { %230 = vmatpush3.bf16.msra.mxu0 %v227_v19 }
  0x12   :  { %232 = vmatprep.subr.bf16.mxu0 %v231_v26 }
  0x15   :  { %234 = vmatpush3.bf16.msra.mxu0 %v231_v26 }
  0x16   :  { %236 = vmatprep.subr.bf16.mxu0 %v235_v29 }
  0x19   :  { %238 = vmatpush3.bf16.msra.mxu0 %v235_v29 }
  0x1a   :  { %240 = vmatprep.subr.bf16.mxu0 %v239_v32 }
  0x1d   :  { %242 = vmatpush3.bf16.msra.mxu0 %v239_v32 }
  0x1e   :  { %244 = vmatprep.subr.bf16.mxu0 %v243_v35 }
  0x21   :  { %246 = vmatpush3.bf16.msra.mxu0 %v243_v35 }
  0x24   :  { %213 = vmatmul.mubr.f32.vlgmr.msra.gmra.mrb[0].mxu0 %v48_v25 }
  0xf7   :  { %v214_v37 = vpop.f32.mrb[0].mxu0 }
  0xf8   :  { %v146_v38 = vadd.f32 %v214_v37, %v161_v36  ;;  %v140_v39 = vpop.f32.mrb[1].mxu0 }
  0xf9   :  { %v141_v40 = vadd.f32 %v161_v36, %v140_v39 }
  0xfa   :  { %150 = vst [vmem:[%s375_s7 + $0x8] sm:$0xff] %v146_v38 }
  0xfb   :  { %149 = vst [vmem:[%s375_s7] sm:$0xff] %v141_v40 }

// kernel: gcn_forward.11
= control target key start
LH: loop header
LB: loop body
LE: loop exit
PB: predicated region body
PF: predicated region fallthrough
CT: control target
= control target key end

     0   :  { %s98_s0 = inlined_call_operand.vmem [shape: f32[16,128], index: 0, kind: input, shape index: {}]   ;;  %s99_s1 = inlined_call_operand.vmem [shape: f32[1,128], index: 1, kind: input, shape index: {}]   ;;  %s100_s2 = inlined_call_operand.vmem [shape: f32[1,128], index: 2, kind: input, shape index: {}]   ;;  %s101_s3 = inlined_call_operand.vmem [shape: f32[16,128], index: 3, kind: input, shape index: {}]   ;;  %s102_s4 = inlined_call_operand.vmem [shape: f32[16,128], index: 4, kind: output, shape index: {}]  }
   0x1   :  { %v17_v0 = vld [vmem:[%s98_s0] sm:$0xff]  ;;  %v18_v4 = vld [vmem:[%s98_s0 + $0x8] sm:$0xff] }
   0x2   :  { %v47_v1 = vld [vmem:[%s99_s1] ss:$0 sm:$0xff]  ;;  %v38_v8 = vld [vmem:[%s101_s3 + $0x8] sm:$0xff] }
   0x3   :  { %v48_v2 = vld [vmem:[%s100_s2] ss:$0 sm:$0xff]  ;;  %v26_v3 = vmul.f32 %v47_v1, %v17_v0  ;;  %v27_v6 = vmul.f32 %v47_v1, %v18_v4 }
   0x4   :  { %v37_v5 = vld [vmem:[%s101_s3] sm:$0xff] }
   0x5   :  { %v35_v7 = vadd.f32 %v48_v2, %v26_v3  ;;  %v36_v9 = vadd.f32 %v48_v2, %v27_v6 }
   0x7   :  { %v39_v10 = vadd.f32 %v37_v5, %v35_v7  ;;  %v40_v11 = vadd.f32 %v38_v8, %v36_v9 }
   0x9   :  { %41 = vst [vmem:[%s102_s4] sm:$0xff] %v39_v10  ;;  %42 = vst [vmem:[%s102_s4 + $0x8] sm:$0xff] %v40_v11 }

// kernel: gcn_forward.10
= control target key start
LH: loop header
LB: loop body
LE: loop exit
PB: predicated region body
PF: predicated region fallthrough
CT: control target
= control target key end

     0   :  { %s333_s3 = inlined_call_operand.vmem [shape: f32[128,128], index: 3, kind: input, shape index: {}]   ;;  %s334_s0 = inlined_call_operand.vmem [shape: f32[16,128], index: 0, kind: input, shape index: {}]   ;;  %s335_s1 = inlined_call_operand.vmem [shape: f32[1,128], index: 1, kind: input, shape index: {}]   ;;  %s336_s2 = inlined_call_operand.vmem [shape: f32[1,128], index: 2, kind: input, shape index: {}]   ;;  %s337_s4 = inlined_call_operand.vmem [shape: f32[1,128], index: 4, kind: input, shape index: {}]   ;;  %s338_s5 = inlined_call_operand.vmem [shape: f32[16,128], index: 5, kind: output, shape index: {}]  }
   0x1   :  { %v42_v0 = vld [vmem:[%s333_s3] sm:$0xff]  ;;  %v43_v1 = vld [vmem:[%s333_s3 + $0x8] sm:$0xff]  ;;  %v44_v2 = vld [vmem:[%s333_s3 + $0x10] sm:$0xff] }
   0x2   :  { %v202_v3 = vpack.c.bf16 %v43_v1, %v42_v0  ;;  %v45_v4 = vld [vmem:[%s333_s3 + $0x18] sm:$0xff]  ;;  %v46_v6 = vld [vmem:[%s333_s3 + $0x20] sm:$0xff]  ;;  %v47_v7 = vld [vmem:[%s333_s3 + $0x28] sm:$0xff] }
   0x3   :  { %v206_v5 = vpack.c.bf16 %v45_v4, %v44_v2  ;;  %v210_v8 = vpack.c.bf16 %v47_v7, %v46_v6  ;;  %v48_v9 = vld [vmem:[%s333_s3 + $0x30] sm:$0xff]  ;;  %v20_v10 = vld [vmem:[%s334_s0] sm:$0xff]  ;;  %v49_v11 = vld [vmem:[%s333_s3 + $0x38] sm:$0xff] }
   0x4   :  { %203 = vmatprep.subr.bf16.mxu0 %v202_v3  ;;  %v146_v12 = vld [vmem:[%s335_s1] ss:$0 sm:$0xff]  ;;  %v214_v15 = vpack.c.bf16 %v49_v11, %v48_v9  ;;  %v51_v18 = vld [vmem:[%s333_s3 + $0x48] sm:$0xff]  ;;  %v52_v21 = vld [vmem:[%s333_s3 + $0x50] sm:$0xff] }
   0x5   :  { %205 = vmatpush3.bf16.msra.mxu0 %v202_v3  ;;  %v147_v13 = vld [vmem:[%s336_s2] ss:$0 sm:$0xff]  ;;  %v29_v14 = vmul.f32 %v146_v12, %v20_v10  ;;  %v53_v22 = vld [vmem:[%s333_s3 + $0x58] sm:$0xff]  ;;  %v55_v25 = vld [vmem:[%s333_s3 + $0x68] sm:$0xff] }
   0x6   :  { %207 = vmatprep.subr.bf16.mxu0 %v206_v5  ;;  %v50_v17 = vld [vmem:[%s333_s3 + $0x40] sm:$0xff]  ;;  %v222_v23 = vpack.c.bf16 %v53_v22, %v52_v21  ;;  %v21_v26 = vld [vmem:[%s334_s0 + $0x8] sm:$0xff]  ;;  %v56_v28 = vld [vmem:[%s333_s3 + $0x70] sm:$0xff] }
   0x7   :  { %v38_v16 = vadd.f32 %v147_v13, %v29_v14  ;;  %v218_v20 = vpack.c.bf16 %v51_v18, %v50_v17  ;;  %v54_v24 = vld [vmem:[%s333_s3 + $0x60] sm:$0xff]  ;;  %v57_v29 = vld [vmem:[%s333_s3 + $0x78] sm:$0xff]  ;;  %v30_v30 = vmul.f32 %v146_v12, %v21_v26 }
   0x8   :  { %v226_v27 = vpack.c.bf16 %v55_v25, %v54_v24  ;;  %v230_v31 = vpack.c.bf16 %v57_v29, %v56_v28  ;;  %v148_v34 = vld [vmem:[%s337_s4] ss:$0 sm:$0xff] }
   0x9   :  { %209 = vmatpush3.bf16.msra.mxu0 %v206_v5  ;;  %v40_v19 = vmax.f32 %v38_v16, 0.0  ;;  %v39_v32 = vadd.f32 %v147_v13, %v30_v30 }
   0xa   :  { %211 = vmatprep.subr.bf16.mxu0 %v210_v8 }
   0xb   :  { %199 = vmatprep.mubr.f32.mxu0 %v40_v19  ;;  %v41_v33 = vmax.f32 %v39_v32, 0.0 }
   0xd   :  { %213 = vmatpush3.bf16.msra.mxu0 %v210_v8 }
   0xe   :  { %215 = vmatprep.subr.bf16.mxu0 %v214_v15 }
  0x11   :  { %217 = vmatpush3.bf16.msra.mxu0 %v214_v15 }
  0x12   :  { %219 = vmatprep.subr.bf16.mxu0 %v218_v20 }
  0x15   :  { %221 = vmatpush3.bf16.msra.mxu0 %v218_v20 }
  0x16   :  { %223 = vmatprep.subr.bf16.mxu0 %v222_v23 }
  0x19   :  { %225 = vmatpush3.bf16.msra.mxu0 %v222_v23 }
  0x1a   :  { %227 = vmatprep.subr.bf16.mxu0 %v226_v27 }
  0x1d   :  { %229 = vmatpush3.bf16.msra.mxu0 %v226_v27 }
  0x1e   :  { %231 = vmatprep.subr.bf16.mxu0 %v230_v31 }
  0x21   :  { %233 = vmatpush3.bf16.msra.mxu0 %v230_v31 }
  0x24   :  { %200 = vmatmul.mubr.f32.vlgmr.msra.gmra.mrb[0].mxu0 %v41_v33 }
  0xf7   :  { %v201_v35 = vpop.f32.mrb[0].mxu0 }
  0xf8   :  { %v137_v36 = vadd.f32 %v201_v35, %v148_v34  ;;  %v131_v37 = vpop.f32.mrb[1].mxu0 }
  0xf9   :  { %v132_v38 = vadd.f32 %v148_v34, %v131_v37 }
  0xfa   :  { %141 = vst [vmem:[%s338_s5 + $0x8] sm:$0xff] %v137_v36 }
  0xfb   :  { %140 = vst [vmem:[%s338_s5] sm:$0xff] %v132_v38 }

// kernel: gcn_forward.8
= control target key start
LH: loop header
LB: loop body
LE: loop exit
PB: predicated region body
PF: predicated region fallthrough
CT: control target
= control target key end

     0   :  { %v678_v0 = vmov 0.0   ;;  %vm679_vm0 = vmmov 0   ;;  %vm50_vm1 = vcmask 130048   ;;  %s912_s1 = inlined_call_operand.vmem [shape: bf16[16,128], index: 1, kind: input, shape index: {}]   ;;  %s913_s0 = inlined_call_operand.vmem [shape: bf16[16,16], index: 0, kind: input, shape index: {}]   ;;  %s914_s3 = inlined_call_operand.vmem [shape: f32[128,128], index: 3, kind: input, shape index: {}]   ;;  %s915_s7 = inlined_call_operand.vmem [shape: f32[128,128], index: 7, kind: input, shape index: {}]   ;;  %s916_s5 = inlined_call_operand.vmem [shape: f32[128,128], index: 5, kind: input, shape index: {}]   ;;  %s917_s2 = inlined_call_operand.vmem [shape: f32[16,128], index: 2, kind: input, shape index: {}]   ;;  %s918_s4 = inlined_call_operand.vmem [shape: f32[1,128], index: 4, kind: input, shape index: {}]   ;;  %s919_s8 = inlined_call_operand.vmem [shape: f32[1,128], index: 8, kind: input, shape index: {}]   ;;  %s920_s10 = inlined_call_operand.vmem [shape: f32[16,128], index: 10, kind: output, shape index: {1}]   ;;  %s921_s6 = inlined_call_operand.vmem [shape: f32[1,128], index: 6, kind: input, shape index: {}]   ;;  %s922_s9 = inlined_call_operand.vmem [shape: f32[16,128], index: 9, kind: output, shape index: {0}]  }
   0x1   :  { %467 = vmatprep.subr.bf16.mxu0 %v678_v0  ;;  %v676_v1 = vld [vmem:[%s912_s1] sm:$0xff]   ;;  %469 = vmatprep.mubr.msk.bf16.mxu0 %vm679_vm0, %v678_v0  ;;  %v96_v4 = vld [vmem:[%s914_s3 + $0x8] sm:$0xff]  ;;  %v97_v5 = vld [vmem:[%s914_s3 + $0x10] sm:$0xff] }
   0x2   :  { %v677_v2 = vld [vmem:[%s913_s0] sm:$0xff]   ;;  %468 = vmatpush3.bf16.msra.mxu0 %v676_v1  ;;  %v98_v7 = vld [vmem:[%s914_s3 + $0x18] sm:$0xff]  ;;  %v100_v10 = vld [vmem:[%s914_s3 + $0x28] sm:$0xff] }
   0x3   :  { %v95_v3 = vld [vmem:[%s914_s3] sm:$0xff]  ;;  %v582_v8 = vpack.c.bf16 %v98_v7, %v97_v5  ;;  %v101_v12 = vld [vmem:[%s914_s3 + $0x30] sm:$0xff]  ;;  %v102_v13 = vld [vmem:[%s914_s3 + $0x38] sm:$0xff] }
   0x4   :  { %v578_v6 = vpack.c.bf16 %v96_v4, %v95_v3  ;;  %v99_v9 = vld [vmem:[%s914_s3 + $0x20] sm:$0xff]  ;;  %v590_v14 = vpack.c.bf16 %v102_v13, %v101_v12  ;;  %v104_v16 = vld [vmem:[%s914_s3 + $0x48] sm:$0xff]  ;;  %v105_v18 = vld [vmem:[%s914_s3 + $0x50] sm:$0xff] }
   0x5   :  { %470 = vmatmul.mubr.msk.bf16.vlgmr.msra.gmra.mrb[0].mxu0 %vm50_vm1, %v677_v2  ;;  %v586_v11 = vpack.c.bf16 %v100_v10, %v99_v9  ;;  %v103_v15 = vld [vmem:[%s914_s3 + $0x40] sm:$0xff]  ;;  %v106_v19 = vld [vmem:[%s914_s3 + $0x58] sm:$0xff]  ;;  %v108_v22 = vld [vmem:[%s914_s3 + $0x68] sm:$0xff] }
   0x6   :  { %579 = vmatprep.subr.bf16.mxu1 %v578_v6  ;;  %v594_v17 = vpack.c.bf16 %v104_v16, %v103_v15  ;;  %v598_v20 = vpack.c.bf16 %v106_v19, %v105_v18  ;;  %v107_v21 = vld [vmem:[%s914_s3 + $0x60] sm:$0xff]  ;;  %v109_v24 = vld [vmem:[%s914_s3 + $0x70] sm:$0xff]  ;;  %v110_v25 = vld [vmem:[%s914_s3 + $0x78] sm:$0xff] }
   0x7   :  { %581 = vmatpush3.bf16.msra.mxu1 %v578_v6  ;;  %v602_v23 = vpack.c.bf16 %v108_v22, %v107_v21  ;;  %v606_v26 = vpack.c.bf16 %v110_v25, %v109_v24  ;;  %v297_v27 = vld [vmem:[%s915_s7] sm:$0xff]  ;;  %v298_v28 = vld [vmem:[%s915_s7 + $0x8] sm:$0xff]  ;;  %v197_v33 = vld [vmem:[%s916_s5 + $0x10] sm:$0xff] }
   0x8   :  { %583 = vmatprep.subr.bf16.mxu1 %v582_v8  ;;  %v195_v29 = vld [vmem:[%s916_s5] sm:$0xff]  ;;  %v642_v30 = vpack.c.bf16 %v298_v28, %v297_v27  ;;  %v196_v31 = vld [vmem:[%s916_s5 + $0x8] sm:$0xff]  ;;  %v198_v34 = vld [vmem:[%s916_s5 + $0x18] sm:$0xff] }
   0x9   :  { %v610_v32 = vpack.c.bf16 %v196_v31, %v195_v29  ;;  %v614_v35 = vpack.c.bf16 %v198_v34, %v197_v33  ;;  %v199_v36 = vld [vmem:[%s916_s5 + $0x20] sm:$0xff]  ;;  %v200_v37 = vld [vmem:[%s916_s5 + $0x28] sm:$0xff]  ;;  %v201_v39 = vld [vmem:[%s916_s5 + $0x30] sm:$0xff] }
   0xa   :  { %v618_v38 = vpack.c.bf16 %v200_v37, %v199_v36  ;;  %v202_v40 = vld [vmem:[%s916_s5 + $0x38] sm:$0xff]  ;;  %v203_v42 = vld [vmem:[%s916_s5 + $0x40] sm:$0xff]  ;;  %v204_v43 = vld [vmem:[%s916_s5 + $0x48] sm:$0xff] }
   0xb   :  { %585 = vmatpush3.bf16.msra.mxu1 %v582_v8  ;;  %611 = vmatprep.subr.bf16.mxu0 %v610_v32  ;;  %v622_v41 = vpack.c.bf16 %v202_v40, %v201_v39  ;;  %v626_v44 = vpack.c.bf16 %v204_v43, %v203_v42  ;;  %v205_v45 = vld [vmem:[%s916_s5 + $0x50] sm:$0xff]  ;;  %v206_v46 = vld [vmem:[%s916_s5 + $0x58] sm:$0xff]  ;;  %v207_v48 = vld [vmem:[%s916_s5 + $0x60] sm:$0xff] }
   0xc   :  { %587 = vmatprep.subr.bf16.mxu1 %v586_v11  ;;  %613 = vmatpush3.bf16.msra.mxu0 %v610_v32  ;;  %v630_v47 = vpack.c.bf16 %v206_v46, %v205_v45  ;;  %v208_v49 = vld [vmem:[%s916_s5 + $0x68] sm:$0xff]  ;;  %v299_v51 = vld [vmem:[%s915_s7 + $0x10] sm:$0xff]  ;;  %v300_v52 = vld [vmem:[%s915_s7 + $0x18] sm:$0xff] }
   0xd   :  { %615 = vmatprep.subr.bf16.mxu0 %v614_v35  ;;  %v634_v50 = vpack.c.bf16 %v208_v49, %v207_v48  ;;  %v646_v55 = vpack.c.bf16 %v300_v52, %v299_v51  ;;  %v301_v57 = vld [vmem:[%s915_s7 + $0x20] sm:$0xff]  ;;  %v302_v58 = vld [vmem:[%s915_s7 + $0x28] sm:$0xff]  ;;  %v303_v61 = vld [vmem:[%s915_s7 + $0x30] sm:$0xff] }
   0xe   :  { %v650_v60 = vpack.c.bf16 %v302_v58, %v301_v57  ;;  %v304_v62 = vld [vmem:[%s915_s7 + $0x38] sm:$0xff]  ;;  %v305_v0 = vld [vmem:[%s915_s7 + $0x40] sm:$0xff]  ;;  %v306_v1 = vld [vmem:[%s915_s7 + $0x48] sm:$0xff] }
   0xf   :  { %589 = vmatpush3.bf16.msra.mxu1 %v586_v11  ;;  %v654_v63 = vpack.c.bf16 %v304_v62, %v303_v61  ;;  %v658_v2 = vpack.c.bf16 %v306_v1, %v305_v0  ;;  %v307_v3 = vld [vmem:[%s915_s7 + $0x50] sm:$0xff]  ;;  %v308_v4 = vld [vmem:[%s915_s7 + $0x58] sm:$0xff]  ;;  %v309_v6 = vld [vmem:[%s915_s7 + $0x60] sm:$0xff] }
  0x10   :  { %591 = vmatprep.subr.bf16.mxu1 %v590_v14  ;;  %617 = vmatpush3.bf16.msra.mxu0 %v614_v35  ;;  %v662_v5 = vpack.c.bf16 %v308_v4, %v307_v3  ;;  %v310_v7 = vld [vmem:[%s915_s7 + $0x68] sm:$0xff]  ;;  %v311_v9 = vld [vmem:[%s915_s7 + $0x70] sm:$0xff]  ;;  %v312_v10 = vld [vmem:[%s915_s7 + $0x78] sm:$0xff] }
  0x11   :  { %619 = vmatprep.subr.bf16.mxu0 %v618_v38  ;;  %v666_v8 = vpack.c.bf16 %v310_v7, %v309_v6  ;;  %v670_v11 = vpack.c.bf16 %v312_v10, %v311_v9  ;;  %v209_v12 = vld [vmem:[%s916_s5 + $0x70] sm:$0xff]  ;;  %v210_v13 = vld [vmem:[%s916_s5 + $0x78] sm:$0xff]  ;;  %v295_v15 = vld [vmem:[%s917_s2] sm:$0xff] }
  0x12   :  { %v296_v16 = vld [vmem:[%s917_s2 + $0x8] sm:$0xff]  ;;  %v410_v24 = vld [vmem:[%s919_s8] ss:$0 sm:$0xff] }
  0x13   :  { %593 = vmatpush3.bf16.msra.mxu1 %v590_v14  ;;  %v638_v14 = vpack.c.bf16 %v210_v13, %v209_v12  ;;  %v409_v29 = vld [vmem:[%s921_s6] ss:$0 sm:$0xff] }
  0x14   :  { %595 = vmatprep.subr.bf16.mxu1 %v594_v17  ;;  %621 = vmatpush3.bf16.msra.mxu0 %v618_v38 }
  0x15   :  { %623 = vmatprep.subr.bf16.mxu0 %v622_v41 }
  0x17   :  { %597 = vmatpush3.bf16.msra.mxu1 %v594_v17  ;;  %v408_v17 = vld [vmem:[%s918_s4] ss:$0 sm:$0xff] }
  0x18   :  { %599 = vmatprep.subr.bf16.mxu1 %v598_v20  ;;  %625 = vmatpush3.bf16.msra.mxu0 %v622_v41 }
  0x19   :  { %627 = vmatprep.subr.bf16.mxu0 %v626_v44 }
  0x1b   :  { %601 = vmatpush3.bf16.msra.mxu1 %v598_v20 }
  0x1c   :  { %603 = vmatprep.subr.bf16.mxu1 %v602_v23  ;;  %629 = vmatpush3.bf16.msra.mxu0 %v626_v44 }
  0x1d   :  { %631 = vmatprep.subr.bf16.mxu0 %v630_v47 }
  0x1f   :  { %605 = vmatpush3.bf16.msra.mxu1 %v602_v23 }
  0x20   :  { %607 = vmatprep.subr.bf16.mxu1 %v606_v26  ;;  %633 = vmatpush3.bf16.msra.mxu0 %v630_v47 }
  0x21   :  { %635 = vmatprep.subr.bf16.mxu0 %v634_v50 }
  0x23   :  { %609 = vmatpush3.bf16.msra.mxu1 %v606_v26 }
  0x24   :  { %643 = vmatprep.subr.bf16.mxu1 %v642_v30  ;;  %637 = vmatpush3.bf16.msra.mxu0 %v634_v50 }
  0x25   :  { %639 = vmatprep.subr.bf16.mxu0 %v638_v14 }
  0x28   :  { %641 = vmatpush3.bf16.msra.mxu0 %v638_v14 }
  0xd8   :  { %v88_v53 = vpop.f32.mrb[0].mxu0 }
  0xd9   :  { %v471_v54 = vpop.f32.mrb[1].mxu0  ;;  %505 = vmatprep.mubr.f32.mxu1 %v88_v53 }
  0xda   :  { %v91_v56 = vpop.f32.mrb[2].mxu0 }
  0xdb   :  { %v472_v59 = vpop.f32.mrb[3].mxu0  ;;  %506 = vmatmul.mubr.f32.vlgmr.msra.gmra.mrb[0].mxu1 %v91_v56 }
  0xdc   :  { %645 = vmatpush3.bf16.msra.mxu1 %v642_v30  ;;  %575 = vmatprep.mubr.f32.mxu1 %v295_v15 }
  0xdd   :  { %647 = vmatprep.subr.bf16.mxu1 %v646_v55 }
  0xe0   :  { %649 = vmatpush3.bf16.msra.mxu1 %v646_v55 }
  0xe1   :  { %651 = vmatprep.subr.bf16.mxu1 %v650_v60 }
  0xe4   :  { %653 = vmatpush3.bf16.msra.mxu1 %v650_v60 }
  0xe5   :  { %655 = vmatprep.subr.bf16.mxu1 %v654_v63 }
  0xe8   :  { %657 = vmatpush3.bf16.msra.mxu1 %v654_v63 }
  0xe9   :  { %659 = vmatprep.subr.bf16.mxu1 %v658_v2 }
  0xec   :  { %661 = vmatpush3.bf16.msra.mxu1 %v658_v2 }
  0xed   :  { %663 = vmatprep.subr.bf16.mxu1 %v662_v5 }
  0xf0   :  { %665 = vmatpush3.bf16.msra.mxu1 %v662_v5 }
  0xf1   :  { %667 = vmatprep.subr.bf16.mxu1 %v666_v8 }
  0xf4   :  { %669 = vmatpush3.bf16.msra.mxu1 %v666_v8 }
  0xf5   :  { %671 = vmatprep.subr.bf16.mxu1 %v670_v11 }
  0xf8   :  { %673 = vmatpush3.bf16.msra.mxu1 %v670_v11 }
  0xfb   :  { %576 = vmatmul.mubr.f32.vlgmr.msra.gmra.mrb[2].mxu1 %v296_v16 }
 0x1ae   :  { %v507_v18 = vpop.f32.mrb[0].mxu1 }
 0x1af   :  { %v190_v19 = vadd.f32 %v507_v18, %v408_v17  ;;  %v184_v20 = vpop.f32.mrb[1].mxu1 }
 0x1b0   :  { %v185_v21 = vadd.f32 %v408_v17, %v184_v20 }
 0x1b1   :  { %v194_v23 = vmax.f32 %v190_v19, 0.0 }
 0x1b2   :  { %v193_v22 = vmax.f32 %v185_v21, 0.0 }
 0x1b4   :  { %540 = vmatprep.mubr.f32.mxu0 %v193_v22 }
 0x1b5   :  { %541 = vmatmul.mubr.f32.vlgmr.msra.gmra.mrb[4].mxu0 %v194_v23 }
 0x1ce   :  { %v577_v25 = vpop.f32.mrb[2].mxu1 }
 0x1cf   :  { %v392_v26 = vadd.f32 %v577_v25, %v410_v24  ;;  %v386_v27 = vpop.f32.mrb[3].mxu1 }
 0x1d0   :  { %v387_v28 = vadd.f32 %v410_v24, %v386_v27 }
 0x1d1   :  { %396 = vst [vmem:[%s920_s10 + $0x8] sm:$0xff] %v392_v26 }
 0x1d2   :  { %395 = vst [vmem:[%s920_s10] sm:$0xff] %v387_v28 }
 0x288   :  { %v542_v30 = vpop.f32.mrb[4].mxu0 }
 0x289   :  { %v290_v31 = vadd.f32 %v542_v30, %v409_v29  ;;  %v284_v32 = vpop.f32.mrb[5].mxu0 }
 0x28a   :  { %v285_v33 = vadd.f32 %v409_v29, %v284_v32 }
 0x28b   :  { %294 = vst [vmem:[%s922_s9 + $0x8] sm:$0xff] %v290_v31 }
 0x28c   :  { %293 = vst [vmem:[%s922_s9] sm:$0xff] %v285_v33 }

</bundles_post_ra>
